<compile_context>
chip_gen: v6e
topology: v6e:2x2x1
jax: 0.10.0
libtpu: 0.0.40
codegen_flags: <defaults>
</compile_context>

<pallas_src>
import functools

import jax
import jax.numpy as jnp
from jax import lax
from jax.experimental import pallas as pl
from jax.experimental.pallas import tpu as pltpu

LANES = 128
SUBLANES = 8


def _sublane_tile_rows(dtype) -> int:
    """Minimum sublane tile for this dtype: 8 (32-bit), 16 (bf16/f16), 32 (8-bit)."""
    itemsize = jnp.dtype(dtype).itemsize
    return max(SUBLANES, 32 // max(1, itemsize))


def _is_v7x() -> bool:
    """Best-effort detection of a 2-TensorCore (v7x-class) chip."""
    try:
        kind = jax.devices()[0].device_kind.lower()
    except Exception:
        return False
    return "7" in kind


def _chunk_sq_sum(p_ref, t_ref, start_row, chunk_rows, *, masked, base_row,
                  valid_rows):
    """sum((p - t)^2) over one (chunk_rows, 128) slice, folded to (8, 128)."""
    p = p_ref[pl.ds(start_row, chunk_rows), :].astype(jnp.float32)
    t = t_ref[pl.ds(start_row, chunk_rows), :].astype(jnp.float32)
    d = p - t
    if masked:
        row = (lax.broadcasted_iota(jnp.int32, (chunk_rows, LANES), 0)
               + (base_row + start_row))
        d = jnp.where(row < valid_rows, d, 0.0)
    d2 = d * d
    # Pure vreg adds (no cross-lane/XLU reduce in the hot loop).
    return d2.reshape(-1, SUBLANES, LANES).sum(axis=0)


def _mse_partial_sum_kernel(p_ref, t_ref, out_ref, *, block_rows, chunk_rows,
                            inner_blocks, full_blocks, valid_rows, needs_mask,
                            unroll):
    """Accumulate sum((p - t)^2) for one split directly into out_ref.

    out_ref: (8, 128) f32 output-resident accumulator for this split (its
    index_map only depends on the split axis, so it stays in VMEM across the
    inner "arbitrary" reduction axis).
    """
    s = pl.program_id(0)  # split index ("parallel": megacore-shardable on v7x)
    j = pl.program_id(1)  # reduction step within the split ("arbitrary")

    @pl.when(j == 0)
    def _():
        out_ref[...] = jnp.zeros_like(out_ref)

    blk = s * inner_blocks + j
    base_row = blk * block_rows
    n_chunks = block_rows // chunk_rows

    def block_sq_sum(masked):
        if n_chunks == 1:
            return _chunk_sq_sum(p_ref, t_ref, 0, chunk_rows, masked=masked,
                                 base_row=base_row, valid_rows=valid_rows)

        def body(c, acc):
            start = pl.multiple_of(c * chunk_rows, chunk_rows)
            return acc + _chunk_sq_sum(p_ref, t_ref, start, chunk_rows,
                                       masked=masked, base_row=base_row,
                                       valid_rows=valid_rows)

        # Chunked accumulation keeps live vregs small (no spills at 4K rows).
        return lax.fori_loop(0, n_chunks, body,
                             jnp.zeros((SUBLANES, LANES), jnp.float32),
                             unroll=unroll)

    if not needs_mask:
        out_ref[...] += block_sq_sum(masked=False)
    else:
        # Only the (at most one per split) ragged / clamped-duplicate block
        # pays for iota+where; every fully-valid block stays on the
        # mask-free fast path.
        @pl.when(blk < full_blocks)
        def _():
            out_ref[...] += block_sq_sum(masked=False)

        @pl.when(blk >= full_blocks)
        def _():
            out_ref[...] += block_sq_sum(masked=True)


def mse_loss_pallas(pred, target, loss_weight=1.0, block_rows=None,
                    core_splits=None):
    """Computes loss_weight * mean((pred - target)**2) with a Pallas TPU kernel."""
    assert pred.shape == target.shape, "pred/target must have identical shapes"
    n = pred.size
    if n == 0:
        return jnp.float32(float("nan"))  # matches mean over empty tensor

    flat_p = pred.reshape(-1)
    flat_t = target.reshape(-1)

    # dtype-aware sublane tile (8 for f32, 16 for bf16/f16, 32 for 8-bit).
    tile_rows = max(_sublane_tile_rows(pred.dtype),
                    _sublane_tile_rows(target.dtype))
    chunk_elems = tile_rows * LANES

    # Bulk = largest prefix that is a whole number of (tile_rows, 128) tiles.
    main_rows = (n // chunk_elems) * tile_rows
    main_elems = main_rows * LANES
    tail_len = n - main_elems

    # Generation-aware defaults: 2-way split only on 2-TC (v7x) chips; bigger
    # blocks on v7x where per-step overhead bites hardest (3.2 TB/s HBM).
    if core_splits is None:
        core_splits = 2 if _is_v7x() else 1
    if block_rows is None:
        block_rows = 8192 if _is_v7x() else 4096

    sq_sum = jnp.float32(0.0)

    if main_rows > 0:
        # Tile size: large, multiple of the dtype sublane tile, capped at the
        # data size.  4096x128 f32 = 2 MiB/buffer -> 2 inputs x 2 pipeline
        # buffers = 8 MiB (16 MiB at 8192 on v7x), within scoped VMEM limits.
        block_rows = min(block_rows, main_rows)
        block_rows = max(tile_rows, (block_rows // tile_rows) * tile_rows)
        if block_rows >= 128:
            block_rows = (block_rows // 128) * 128  # keep chunking exact
            chunk_rows = 128                        # (128,128)f32 = 16 vregs/array
        else:
            chunk_rows = block_rows
        n_chunks = block_rows // chunk_rows
        unroll = True if n_chunks <= 8 else 8

        nb = pl.cdiv(main_rows, block_rows)          # blocks in the bulk
        num_splits = max(1, min(core_splits, nb))    # v7x: 2-way TC split
        inner_blocks = pl.cdiv(nb, num_splits)
        full_blocks = main_rows // block_rows        # blocks with no ragged rows
        needs_mask = (main_rows % block_rows != 0) or (num_splits * inner_blocks != nb)

        p2d = flat_p[:main_elems].reshape(main_rows, LANES)
        t2d = flat_t[:main_elems].reshape(main_rows, LANES)

        def in_index_map(s, j):
            blk = s * inner_blocks + j
            # Clamp fully-out-of-range blocks (their contribution is masked to
            # zero in the kernel); avoids out-of-bounds DMA windows.
            return (jnp.minimum(blk, nb - 1), 0)

        kernel = functools.partial(
            _mse_partial_sum_kernel,
            block_rows=block_rows,
            chunk_rows=chunk_rows,
            inner_blocks=inner_blocks,
            full_blocks=full_blocks,
            valid_rows=main_rows,
            needs_mask=needs_mask,
            unroll=unroll,
        )

        bytes_in = main_elems * (p2d.dtype.itemsize + t2d.dtype.itemsize)
        cost = pl.CostEstimate(
            flops=3 * main_elems,
            transcendentals=0,
            bytes_accessed=bytes_in + num_splits * SUBLANES * LANES * 4,
        )

        partials = pl.pallas_call(
            kernel,
            out_shape=jax.ShapeDtypeStruct((num_splits * SUBLANES, LANES),
                                           jnp.float32),
            grid_spec=pltpu.PrefetchScalarGridSpec(
                num_scalar_prefetch=0,
                grid=(num_splits, inner_blocks),
                in_specs=[
                    pl.BlockSpec((block_rows, LANES), in_index_map),
                    pl.BlockSpec((block_rows, LANES), in_index_map),
                ],
                # Output-resident accumulator (P3): same block across j.
                out_specs=pl.BlockSpec((SUBLANES, LANES), lambda s, j: (s, 0)),
            ),
            compiler_params=pltpu.CompilerParams(
                dimension_semantics=("parallel", "arbitrary"),
                vmem_limit_bytes=32 * 1024 * 1024,
            ),
            cost_estimate=cost,
        )(p2d, t2d)

        # Single cross-lane reduce over the tiny partial-sum slabs.
        sq_sum = sq_sum + jnp.sum(partials)

    if tail_len:
        # Tiny (< tile_rows*128 element) epilogue in plain JAX instead of
        # padding/copying the full inputs in HBM.
        tp = flat_p[main_elems:].astype(jnp.float32)
        tt = flat_t[main_elems:].astype(jnp.float32)
        sq_sum = sq_sum + jnp.sum(jnp.square(tp - tt))

    return sq_sum * jnp.float32(loss_weight / n)


class MSELossPallas:
    """Mirror of the PyTorch MSELoss module (no parameters)."""

    def __init__(self, loss_weight=1.0, reduction="mean"):
        if reduction not in ["none", "mean", "sum"]:
            raise ValueError(f"Unsupported reduction mode: {reduction}")
        # The reference forward always calls F.mse_loss with default 'mean'
        # and ignores `weight`; we reproduce that behavior exactly.
        # TODO(synk): 'none'/'sum' reductions and element-wise `weight` are
        # accepted but not applied, matching the reference forward.
        self.loss_weight = loss_weight
        self.reduction = reduction

    def __call__(self, pred, target, weight=None, **kwargs):
        return mse_loss_pallas(pred, target, loss_weight=self.loss_weight)


if __name__ == "__main__":
    key = jax.random.PRNGKey(0)
    k1, k2, k3, k4, k5, k6, k7, k8 = jax.random.split(key, 8)

    # 1) NCHW, small shapes: batch=2, channels=4, spatial=16x16 (single block).
    pred = jax.random.normal(k1, (2, 4, 16, 16), dtype=jnp.float32)
    target = jax.random.normal(k2, (2, 4, 16, 16), dtype=jnp.float32)
    loss_fn = MSELossPallas(loss_weight=1.0, reduction="mean")
    loss = loss_fn(pred, target)
    jax.block_until_ready(loss)
    ref = jnp.mean((pred - target) ** 2)
    assert jnp.allclose(loss, ref, rtol=1e-5, atol=1e-6), (loss, ref)

    # 2) Ragged shape with forced tiny blocks + 2-way split: exercises the
    #    pl.when-gated mask on the single ragged/duplicate block and the
    #    lane-remainder tail epilogue.
    pred2 = jax.random.normal(k3, (2, 3, 40, 40), dtype=jnp.float32)
    target2 = jax.random.normal(k4, (2, 3, 40, 40), dtype=jnp.float32)
    loss2 = mse_loss_pallas(pred2, target2, loss_weight=0.5,
                            block_rows=8, core_splits=2)
    jax.block_until_ready(loss2)
    ref2 = 0.5 * jnp.mean((pred2 - target2) ** 2)
    assert jnp.allclose(loss2, ref2, rtol=1e-5, atol=1e-6), (loss2, ref2)

    # 3) Larger input: exercises the chunked fori_loop accumulate, both with
    #    an explicit 2-way split (mask-free multi-block path) and with the
    #    generation-aware defaults.
    pred3 = jax.random.normal(k5, (4, 4, 128, 128), dtype=jnp.float32)
    target3 = jax.random.normal(k6, (4, 4, 128, 128), dtype=jnp.float32)
    ref3 = jnp.mean((pred3 - target3) ** 2)
    loss3a = mse_loss_pallas(pred3, target3, block_rows=1024, core_splits=2)
    loss3b = mse_loss_pallas(pred3, target3)  # defaults
    jax.block_until_ready((loss3a, loss3b))
    assert jnp.allclose(loss3a, ref3, rtol=1e-5, atol=1e-6), (loss3a, ref3)
    assert jnp.allclose(loss3b, ref3, rtol=1e-5, atol=1e-6), (loss3b, ref3)

    # 4) bf16 inputs: exercises the dtype-aware (16, 128) sublane tile and
    #    in-kernel f32 accumulation.
    pred4 = jax.random.normal(k7, (2, 4, 32, 32), dtype=jnp.bfloat16)
    target4 = jax.random.normal(k8, (2, 4, 32, 32), dtype=jnp.bfloat16)
    loss4 = mse_loss_pallas(pred4, target4)
    jax.block_until_ready(loss4)
    ref4 = jnp.mean((pred4.astype(jnp.float32) - target4.astype(jnp.float32)) ** 2)
    assert jnp.allclose(loss4, ref4, rtol=1e-3, atol=1e-4), (loss4, ref4)

    print("KERNEL_OK")
</pallas_src>

<mosaic_0001>
module attributes {stable_mosaic.version = 11 : i64} {
  func.func @_mse_partial_sum_kernel(%arg0: i32, %arg1: i32, %arg2: memref<16x128xf32, #tpu.memory_space<vmem>>, %arg3: memref<16x128xf32, #tpu.memory_space<vmem>>, %arg4: memref<8x128xf32, #tpu.memory_space<vmem>>) attributes {dimension_semantics = [#tpu.dimension_semantics<parallel>, #tpu.dimension_semantics<arbitrary>], iteration_bounds = array<i64: 1, 1>, scalar_prefetch = 0 : i64, scratch_operands = 0 : i64, tpu.core_type = #tpu.core_type<tc>, window_params = [{transform_indices = @transform_0, window_bounds = array<i64: 16, 128>}, {transform_indices = @transform_1, window_bounds = array<i64: 16, 128>}, {transform_indices = @transform_2, window_bounds = array<i64: 8, 128>}]} {
    %c0_i32 = arith.constant 0 : i32
    %0 = arith.cmpi eq, %arg1, %c0_i32 : i32
    %1 = arith.extui %0 : i1 to i32
    %c0_i32_0 = arith.constant 0 : i32
    %2 = arith.cmpi ne, %1, %c0_i32_0 : i32
    scf.if %2 {
      %cst_8 = arith.constant 0.000000e+00 : f32
      %12 = vector.broadcast %cst_8 : f32 to vector<8x128xf32>
      %c0_9 = arith.constant 0 : index
      %c0_10 = arith.constant 0 : index
      %13 = vector.load %arg4[%c0_9, %c0_10] : memref<8x128xf32, #tpu.memory_space<vmem>>, vector<8x128xf32>
      tpu.vector_store %arg4[%c0_9, %c0_10], %12 {strides = array<i32>} : memref<8x128xf32, #tpu.memory_space<vmem>>, vector<8x128xf32>,
    } else {
    }
    %c0 = arith.constant 0 : index
    %c0_1 = arith.constant 0 : index
    %3 = vector.load %arg4[%c0, %c0_1] : memref<8x128xf32, #tpu.memory_space<vmem>>, vector<8x128xf32>
    %c0_2 = arith.constant 0 : index
    %c0_3 = arith.constant 0 : index
    %4 = vector.load %arg2[%c0_2, %c0_3] : memref<16x128xf32, #tpu.memory_space<vmem>>, vector<16x128xf32>
    %c0_4 = arith.constant 0 : index
    %c0_5 = arith.constant 0 : index
    %5 = vector.load %arg3[%c0_4, %c0_5] : memref<16x128xf32, #tpu.memory_space<vmem>>, vector<16x128xf32>
    %6 = arith.subf %4, %5 : vector<16x128xf32>
    %7 = arith.mulf %6, %6 : vector<16x128xf32>
    %8 = vector.shape_cast %7 : vector<16x128xf32> to vector<2x8x128xf32>
    %cst = arith.constant dense<0.000000e+00> : vector<8x128xf32>
    %9 = vector.multi_reduction <add>, %8, %cst [0] : vector<2x8x128xf32> to vector<8x128xf32>
    %10 = arith.addf %3, %9 : vector<8x128xf32>
    %c0_6 = arith.constant 0 : index
    %c0_7 = arith.constant 0 : index
    %11 = vector.load %arg4[%c0_6, %c0_7] : memref<8x128xf32, #tpu.memory_space<vmem>>, vector<8x128xf32>
    tpu.vector_store %arg4[%c0_6, %c0_7], %10 {strides = array<i32>} : memref<8x128xf32, #tpu.memory_space<vmem>>, vector<8x128xf32>,
    return
  }
  func.func @transform_0(%arg0: i32, %arg1: i32) -> (i32, i32) {
    %c1_i32 = arith.constant 1 : i32
    %0 = arith.muli %arg0, %c1_i32 : i32
    %1 = arith.addi %0, %arg1 : i32
    %c0_i32 = arith.constant 0 : i32
    %2 = arith.minsi %1, %c0_i32 : i32
    %c0_i32_0 = arith.constant 0 : i32
    %c0_i32_1 = arith.constant 0 : i32
    return %2, %c0_i32_0 : i32, i32
  }
  func.func @transform_1(%arg0: i32, %arg1: i32) -> (i32, i32) {
    %c1_i32 = arith.constant 1 : i32
    %0 = arith.muli %arg0, %c1_i32 : i32
    %1 = arith.addi %0, %arg1 : i32
    %c0_i32 = arith.constant 0 : i32
    %2 = arith.minsi %1, %c0_i32 : i32
    %c0_i32_0 = arith.constant 0 : i32
    %c0_i32_1 = arith.constant 0 : i32
    return %2, %c0_i32_0 : i32, i32
  }
  func.func @transform_2(%arg0: i32, %arg1: i32) -> (i32, i32) {
    %c0_i32 = arith.constant 0 : i32
    %c0_i32_0 = arith.constant 0 : i32
    return %arg0, %c0_i32 : i32, i32
  }
}

</mosaic_0001>

<bundles_post_ra>
// kernel: tpu_custom_call.1
= control target key start
LH: loop header
LB: loop body
LE: loop exit
PB: predicated region body
PF: predicated region fallthrough
CT: control target
= control target key end

     0   :  { %7 = vsyncpa [#allocation3], 0  ;;  %s198_s0 = inlined_call_operand.hbm [shape: f32[16,128], index: 0, kind: input, shape index: {}]   ;;  %s199_s1 = inlined_call_operand.hbm [shape: f32[16,128], index: 1, kind: input, shape index: {}]   ;;  %s200_s2 = inlined_call_operand.hbm [shape: f32[8,128], index: 2, kind: output, shape index: {}]  }
   0x1   :  { %8 = vsyncpa [#allocation6], 0 }
   0x2   :  { %9 = vsyncpa [#allocation4], 0  ;;  %s169_s9 = smov [#allocation2]  }
   0x3   :  { %s21_s10 = sshll.u32 %s169_s9, 4  ;;  %s22_s10 = int_to_ptr.vmem [resolvable:$true] %s21_s10 }
   0x4   :  { %s111_s11 = scalar_lea.vmem %s22_s10, 256  ;;  %p116_p1 = scmp.lt.s32.totalorder %s22_s10, %s22_s10 }
   0x5   :  { %p112_p0 = scmp.ne.s32.totalorder %s22_s10, %s111_s11  ;;  %p117_p2 = scmp.lt.s32.totalorder %s111_s11, %s111_s11 }
   0x7   :  { %p118_p3 = por %p117_p2, %p116_p1 }
   0x9   :  { %p119_p4 = pnand %p118_p3, %p112_p0 }
   0xb   :  { %122 = shalt.err (!%p119_p4)
}
   0xc   :  { %s170_s12 = smov 128   ;;  %s171_s13 = smov 8  }
   0xd   :  { %27 = dma.hbm_to_vmem [thread:$0]  %s198_s0, 256, %s22_s10, [#allocation3], %s170_s12, %s170_s12, %s171_s13  }
   0xe   :  { %s172_s16 = smov [#allocation5]  }
   0xf   :  { %s39_s17 = sshll.u32 %s172_s16, 4  ;;  %s40_s17 = int_to_ptr.vmem [resolvable:$true] %s39_s17 }
  0x10   :  { %s131_s18 = scalar_lea.vmem %s40_s17, 256  ;;  %p136_p6 = scmp.lt.s32.totalorder %s40_s17, %s40_s17 }
  0x11   :  { %p132_p5 = scmp.ne.s32.totalorder %s40_s17, %s131_s18  ;;  %p137_p7 = scmp.lt.s32.totalorder %s131_s18, %s131_s18 }
  0x13   :  { %p138_p8 = por %p137_p7, %p136_p6 }
  0x15   :  { %p139_p9 = pnand %p138_p8, %p132_p5 }
  0x17   :  { %142 = shalt.err (!%p139_p9)
}
  0x18   :  { %45 = dma.hbm_to_vmem [thread:$0]  %s199_s1, 256, %s40_s17, [#allocation6], %s170_s12, %s170_s12, %s171_s13  }
  0x19   :  { %163 = dma.done.wait [#allocation3], 256  }
  0x1a   :  { %164 = vsyncadd [#allocation3], 4294967040 }
  0x1b   :  { %165 = dma.done.wait [#allocation6], 256  }
  0x1c   :  { %166 = vsyncadd [#allocation6], 4294967040  ;;  %v66_v0 = vld [vmem:[#allocation2] sm:$0xff]  ;;  %v67_v1 = vld [vmem:[#allocation2 + $0x8] sm:$0xff]  ;;  %s173_s0 = smov [#allocation7]  }
  0x1d   :  { %v68_v2 = vld [vmem:[#allocation5] sm:$0xff]  ;;  %v69_v3 = vld [vmem:[#allocation5 + $0x8] sm:$0xff]  ;;  %s83_s21 = sshll.u32 %s173_s0, 4  ;;  %s84_s21 = int_to_ptr.vmem [resolvable:$true] %s83_s21 }
  0x1e   :  { %v70_v4 = vsub.f32 %v66_v0, %v68_v2  ;;  %v71_v5 = vsub.f32 %v67_v1, %v69_v3  ;;  %s143_s22 = scalar_lea.vmem %s84_s21, 128  ;;  %p148_p11 = scmp.lt.s32.totalorder %s84_s21, %s84_s21 }
  0x1f   :  { %p144_p10 = scmp.ne.s32.totalorder %s84_s21, %s143_s22  ;;  %p149_p12 = scmp.lt.s32.totalorder %s143_s22, %s143_s22 }
  0x20   :  { %v72_v6 = vmul.f32 %v70_v4, %v70_v4  ;;  %v73_v7 = vmul.f32 %v71_v5, %v71_v5 }
  0x21   :  { %p150_p13 = por %p149_p12, %p148_p11 }
  0x22   :  { %v74_v8 = vadd.f32 %v73_v7, %v72_v6 }
  0x23   :  { %p151_p0 = pnand %p150_p13, %p144_p10 }
  0x24   :  { %76 = vst [vmem:[#allocation7] sm:$0xff] %v74_v8 }
  0x25   :  { %154 = shalt.err (!%p151_p0)
}
  0x26   :  { %86 = dma.vmem_to_hbm [thread:$0]  %s84_s21, 128, %s200_s2, [#allocation4]  }
  0x27   :  { %167 = dma.done.wait [#allocation4], 128  }
  0x28   :  { %168 = vsyncadd [#allocation4], 4294967168 }
  0x29   :  { %90 = vsyncpa [#allocation3], 1 }
  0x2a   :  { %91 = vsyncpa [#allocation6], 1 }
  0x2b   :  { %92 = vsyncpa [#allocation4], 1 }

</bundles_post_ra>
